<compile_context>
chip_gen: v7x
topology: tpu7x:2x2x1
jax: 0.10.0
libtpu: 0.0.40
codegen_flags: <defaults>
</compile_context>

<pallas_src>
import numpy as np
import jax
import jax.numpy as jnp
from jax.experimental import pallas as pl
from jax.experimental.pallas import tpu as pltpu

BUFFER_SIZE = 30
KNN_SIZE = 1


# ----------------------------- Pallas kernel --------------------------------

def _fused_conv_entropy_kernel(x_ref, w_ref, b_ref, out_ref, ent_ref):
    # x_ref:   (N, C, TP)   input pixels for this tile (pixels on lanes)
    # w_ref:   (C, K, 1)    1x1-conv weight, K already on sublanes per channel
    # b_ref:   (K, 1)       bias as a sublane vector
    # out_ref: (N, K, TP)   logits for this tile (lane-dense output)
    # ent_ref: (1, TP)      per-pixel entropy for this tile (lane-dense output)
    n, c_in, tp = x_ref.shape
    k = b_ref.shape[0]

    x = x_ref[...]                                   # (N, C, TP)
    b = b_ref[...]                                   # (K, 1)

    # --- model(x): 1x1 conv as an unrolled VPU multiply-add over C -----------
    # logits[n,k,p] = sum_c w[k,c] * x[n,c,p] + b[k].  The MXU would be <4%
    # utilized here and the kernel is HBM/EUP bound, so keep it on the VPU.
    acc = None
    for c in range(c_in):
        w_c = w_ref[c][None, :, :]                   # (1, K, 1)  lane-broadcast
        x_c = x[:, c, :][:, None, :]                 # (N, 1, TP) sublane-broadcast
        term = w_c * x_c                             # (N, K, TP)
        acc = term if acc is None else acc + term
    acc = acc + b[None, :, :]                        # (N, K, TP) f32 logits
    out_ref[...] = acc.astype(out_ref.dtype)

    # --- softmax_entropy over the joint N*K axis, per pixel column -----------
    # torch: x.view(-1, H, W).softmax(0) -> reduce over all N*K rows per pixel.
    # ent_pixel = log(z) - S/z  with  t = logits - m, z = sum exp(t), S = sum t*exp(t)
    m = jnp.max(acc, axis=1, keepdims=True)          # (N, 1, TP) sublane reduce
    m = jnp.max(m, axis=0, keepdims=True)            # (1, 1, TP)
    t = acc - m
    ex = jnp.exp(t)
    z = jnp.sum(ex, axis=1, keepdims=True)           # (N, 1, TP)
    z = jnp.sum(z, axis=0, keepdims=True)            # (1, 1, TP)
    s = jnp.sum(ex * t, axis=1, keepdims=True)       # (N, 1, TP)
    s = jnp.sum(s, axis=0, keepdims=True)            # (1, 1, TP)
    ent = jnp.log(z) - s * pl.reciprocal(z, approx=True)   # (1, 1, TP)
    ent_ref[...] = ent[0]                            # (1, TP) lane-dense write


# ----------------------------- Pallas wrapper --------------------------------

def _round_up(v, m):
    return ((v + m - 1) // m) * m


def _plan_pixels(hw, max_tile_p):
    """Return (padded_hw, tile): both multiples of 128, tile divides padded_hw,
    tile <= max_tile_p, and >= 2 grid steps whenever hw allows it (v7x megacore)."""
    max_tile = max(128, (max_tile_p // 128) * 128)
    hw128 = _round_up(hw, 128)

    if hw128 <= max_tile:
        if hw128 >= 256:
            tile = 128
            while tile * 2 <= hw128 // 2 and hw128 % (tile * 2) == 0:
                tile *= 2
            return hw128, tile                       # >= 2 tiles
        return hw128, hw128                          # tiny image, single tile

    # Large image: largest multiple-of-128 divisor of hw128 that is <= max_tile.
    tile = max_tile
    while hw128 % tile != 0:
        tile -= 128
    if tile < max_tile // 2:
        # Divisors are all small; pad up to a multiple of max_tile instead so
        # per-step overhead stays negligible (pad pixels are masked host-side).
        tile = max_tile
        hw128 = _round_up(hw128, tile)
    return hw128, tile


def conv1x1_entropy_pallas(x, w, b, *, max_tile_p=8192):
    """Fused synthetic model (1x1 conv C_in->K) + softmax-entropy loss.

    x: (N, C, H, W) f32, w: (K, C), b: (K,).
    Returns (logits (N, K, H, W) f32, entropy scalar f32).
    """
    N, C, H, W = x.shape
    K = w.shape[0]
    HW = H * W

    hw_pad, tile = _plan_pixels(HW, max_tile_p)
    num_tiles = hw_pad // tile

    x3 = x.reshape(N, C, HW).astype(jnp.float32)     # contiguous: free reshape
    if hw_pad != HW:
        x3 = jnp.pad(x3, ((0, 0), (0, 0), (0, hw_pad - HW)))
    wk = jnp.asarray(w, jnp.float32).T.reshape(C, K, 1)   # K on sublanes per channel
    bk = jnp.asarray(b, jnp.float32).reshape(K, 1)        # sublane bias

    # VMEM budget: double-buffered in/out blocks + in-kernel intermediates,
    # with 2x headroom, clamped to a limit that is safe on v5e/v6e/v7x.
    est = (2 * N * C + 5 * N * K + 2) * tile * 4
    vmem_limit = int(min(48 * 1024 * 1024, max(16 * 1024 * 1024, 2 * est)))

    logits3, ent_pix = pl.pallas_call(
        _fused_conv_entropy_kernel,
        out_shape=(
            jax.ShapeDtypeStruct((N, K, hw_pad), jnp.float32),
            jax.ShapeDtypeStruct((1, hw_pad), jnp.float32),
        ),
        grid=(num_tiles,),
        in_specs=[
            pl.BlockSpec((N, C, tile), lambda j: (0, 0, j)),
            pl.BlockSpec((C, K, 1), lambda j: (0, 0, 0)),
            pl.BlockSpec((K, 1), lambda j: (0, 0)),
        ],
        out_specs=(
            pl.BlockSpec((N, K, tile), lambda j: (0, 0, j)),
            pl.BlockSpec((1, tile), lambda j: (0, j)),
        ),
        compiler_params=pltpu.CompilerParams(
            dimension_semantics=("parallel",),
            vmem_limit_bytes=vmem_limit,
        ),
    )(x3, wk, bk)

    logits = logits3[:, :, :HW].reshape(N, K, H, W)       # drop lane padding
    entropy = jnp.sum(ent_pix[0, :HW]) / HW               # pad pixels excluded
    return logits, entropy


# ----------------------------- Glue (plain JAX / host) -----------------------

def fda_get_amp_pha(x):
    # TODO(synk): FFT has no Pallas TPU primitive; amplitude/phase via XLA FFT.
    fx = jnp.fft.fft2(x.astype(jnp.float32), axes=(-2, -1))
    return jnp.abs(fx), jnp.angle(fx)


class ReplayMemory:
    def __init__(self, buffer_size):
        self.buffer_size = buffer_size
        self.items = []

    def get_size(self):
        return len(self.items)

    def push(self, key, value):
        self.items.append((key, value))
        if len(self.items) > self.buffer_size:
            self.items.pop(0)

    def get_neighbours(self, key, k=1):
        # TODO(synk): faiss-style kNN retrieval not translated; never reached on a fresh memory.
        raise NotImplementedError


class TentPallas:
    """JAX/Pallas analogue of Tent wrapping a synthetic 1x1-conv model."""

    def __init__(self, w, b, steps=1, episodic=False):
        self.w = jnp.asarray(w, jnp.float32)
        self.b = jnp.asarray(b, jnp.float32)
        self.steps = steps
        self.episodic = episodic
        self.memory = ReplayMemory(BUFFER_SIZE)
        # copy_model_and_optimizer
        self._w0, self._b0 = self.w, self.b
        self.last_loss = None

    def reset(self):
        self.memory = ReplayMemory(BUFFER_SIZE)
        self.w, self.b = self._w0, self._b0

    def _forward_and_adapt(self, x):
        # Amplitude/phase computed ONCE and reused for the memory push below.
        amp, _pha = fda_get_amp_pha(x)
        diff_loss = 0.0
        # fresh memory => memory.get_size() <= KNN_SIZE => retrieval branch skipped
        if self.memory.get_size() > KNN_SIZE:
            # TODO(synk): kNN-style memory retrieval / KL-div lr rescaling not translated.
            pass

        # model(x) and softmax_entropy fused in one Pallas kernel.
        outputs, entropy = conv1x1_entropy_pallas(x, self.w, self.b)
        self.last_loss = entropy + abs(diff_loss)
        # TODO(synk): loss.backward(); optimizer.step() parameter update omitted.

        self.memory.push(np.asarray(amp), np.asarray(amp))
        return outputs

    def forward(self, x):
        if self.episodic:
            self.reset()
        outputs = None
        for _ in range(self.steps):
            outputs = self._forward_and_adapt(x)
        return outputs


# ----------------------------------- main ------------------------------------

if __name__ == "__main__":
    key = jax.random.PRNGKey(0)
    kx, kw, kb = jax.random.split(key, 3)

    N, C, H, W = 2, 4, 16, 16   # small NCHW input (H*W=256 -> 2 pixel tiles of 128)
    K = 8                       # classes produced by the synthetic 1x1-conv model

    x = jax.random.normal(kx, (N, C, H, W), dtype=jnp.float32)
    w = 0.1 * jax.random.normal(kw, (K, C), dtype=jnp.float32)
    b = 0.01 * jax.random.normal(kb, (K,), dtype=jnp.float32)

    def ref_forward(xi):
        ref_logits = jnp.einsum('kc,nchw->nkhw', w, xi) + b[None, :, None, None]
        xr = ref_logits.reshape(-1, xi.shape[2], xi.shape[3])
        sm = jax.nn.softmax(xr, axis=0)
        lsm = jax.nn.log_softmax(xr, axis=0)
        ref_loss = -(sm * lsm).sum() / (xi.shape[2] * xi.shape[3])
        return ref_logits, ref_loss

    tent = TentPallas(w, b, steps=1, episodic=False)
    out = tent.forward(x)
    jax.block_until_ready(out)
    jax.block_until_ready(tent.last_loss)

    ref_logits, ref_loss = ref_forward(x)
    assert out.shape == (N, K, H, W)
    assert jnp.allclose(out, ref_logits, atol=1e-4, rtol=1e-4)
    assert jnp.allclose(tent.last_loss, ref_loss, atol=1e-3, rtol=1e-3)

    # Padding path: H*W not a multiple of 128 (exercises lane-pad + host-side mask).
    H2 = W2 = 15
    x2 = jax.random.normal(jax.random.PRNGKey(1), (N, C, H2, W2), dtype=jnp.float32)
    out2, loss2 = conv1x1_entropy_pallas(x2, w, b)
    jax.block_until_ready(out2)
    ref_logits2, ref_loss2 = ref_forward(x2)
    assert out2.shape == (N, K, H2, W2)
    assert jnp.allclose(out2, ref_logits2, atol=1e-4, rtol=1e-4)
    assert jnp.allclose(loss2, ref_loss2, atol=1e-3, rtol=1e-3)

    print("KERNEL_OK")
</pallas_src>

<mosaic_0001>
module attributes {stable_mosaic.version = 11 : i64} {
  func.func @_fused_conv_entropy_kernel(%arg0: i32, %arg1: memref<2x4x128xf32, #tpu.memory_space<vmem>>, %arg2: memref<4x8x1xf32, #tpu.memory_space<vmem>>, %arg3: memref<8x1xf32, #tpu.memory_space<vmem>>, %arg4: memref<2x8x128xf32, #tpu.memory_space<vmem>>, %arg5: memref<1x128xf32, #tpu.memory_space<vmem>>) attributes {dimension_semantics = [#tpu.dimension_semantics<parallel>], iteration_bounds = array<i64: 2>, scalar_prefetch = 0 : i64, scratch_operands = 0 : i64, tpu.core_type = #tpu.core_type<tc>, window_params = [{transform_indices = @transform_0, window_bounds = array<i64: 2, 4, 128>}, {pipeline_mode = #tpu.pipeline_mode<synchronous>, transform_indices = @transform_1, window_bounds = array<i64: 4, 8, 1>}, {pipeline_mode = #tpu.pipeline_mode<synchronous>, transform_indices = @transform_2, window_bounds = array<i64: 8, 1>}, {transform_indices = @transform_3, window_bounds = array<i64: 2, 8, 128>}, {transform_indices = @transform_4, window_bounds = array<i64: 1, 128>}]} {
    %c0 = arith.constant 0 : index
    %c0_0 = arith.constant 0 : index
    %c0_1 = arith.constant 0 : index
    %0 = vector.load %arg1[%c0, %c0_0, %c0_1] : memref<2x4x128xf32, #tpu.memory_space<vmem>>, vector<2x4x128xf32>
    %c0_2 = arith.constant 0 : index
    %c0_3 = arith.constant 0 : index
    %1 = vector.load %arg3[%c0_2, %c0_3] : memref<8x1xf32, #tpu.memory_space<vmem>>, vector<8x1xf32>
    %c0_4 = arith.constant 0 : index
    %c0_5 = arith.constant 0 : index
    %c0_6 = arith.constant 0 : index
    %2 = vector.load %arg2[%c0_4, %c0_5, %c0_6] : memref<4x8x1xf32, #tpu.memory_space<vmem>>, vector<1x8x1xf32>
    %3 = vector.shape_cast %2 : vector<1x8x1xf32> to vector<8x1xf32>
    %4 = vector.shape_cast %3 : vector<8x1xf32> to vector<1x8x1xf32>
    %5 = vector.extract_strided_slice %0 {offsets = [0, 0, 0], sizes = [2, 1, 128], strides = [1, 1, 1]} : vector<2x4x128xf32> to vector<2x1x128xf32>
    %6 = vector.shape_cast %5 : vector<2x1x128xf32> to vector<2x128xf32>
    %7 = vector.shape_cast %6 : vector<2x128xf32> to vector<2x1x128xf32>
    %8 = vector.broadcast %4 : vector<1x8x1xf32> to vector<2x8x128xf32>
    %9 = vector.broadcast %7 : vector<2x1x128xf32> to vector<2x8x128xf32>
    %10 = arith.mulf %8, %9 : vector<2x8x128xf32>
    %c1 = arith.constant 1 : index
    %c0_7 = arith.constant 0 : index
    %c0_8 = arith.constant 0 : index
    %11 = vector.load %arg2[%c1, %c0_7, %c0_8] : memref<4x8x1xf32, #tpu.memory_space<vmem>>, vector<1x8x1xf32>
    %12 = vector.shape_cast %11 : vector<1x8x1xf32> to vector<8x1xf32>
    %13 = vector.shape_cast %12 : vector<8x1xf32> to vector<1x8x1xf32>
    %14 = vector.extract_strided_slice %0 {offsets = [0, 1, 0], sizes = [2, 1, 128], strides = [1, 1, 1]} : vector<2x4x128xf32> to vector<2x1x128xf32>
    %15 = vector.shape_cast %14 : vector<2x1x128xf32> to vector<2x128xf32>
    %16 = vector.shape_cast %15 : vector<2x128xf32> to vector<2x1x128xf32>
    %17 = vector.broadcast %13 : vector<1x8x1xf32> to vector<2x8x128xf32>
    %18 = vector.broadcast %16 : vector<2x1x128xf32> to vector<2x8x128xf32>
    %19 = arith.mulf %17, %18 : vector<2x8x128xf32>
    %20 = arith.addf %10, %19 : vector<2x8x128xf32>
    %c2 = arith.constant 2 : index
    %c0_9 = arith.constant 0 : index
    %c0_10 = arith.constant 0 : index
    %21 = vector.load %arg2[%c2, %c0_9, %c0_10] : memref<4x8x1xf32, #tpu.memory_space<vmem>>, vector<1x8x1xf32>
    %22 = vector.shape_cast %21 : vector<1x8x1xf32> to vector<8x1xf32>
    %23 = vector.shape_cast %22 : vector<8x1xf32> to vector<1x8x1xf32>
    %24 = vector.extract_strided_slice %0 {offsets = [0, 2, 0], sizes = [2, 1, 128], strides = [1, 1, 1]} : vector<2x4x128xf32> to vector<2x1x128xf32>
    %25 = vector.shape_cast %24 : vector<2x1x128xf32> to vector<2x128xf32>
    %26 = vector.shape_cast %25 : vector<2x128xf32> to vector<2x1x128xf32>
    %27 = vector.broadcast %23 : vector<1x8x1xf32> to vector<2x8x128xf32>
    %28 = vector.broadcast %26 : vector<2x1x128xf32> to vector<2x8x128xf32>
    %29 = arith.mulf %27, %28 : vector<2x8x128xf32>
    %30 = arith.addf %20, %29 : vector<2x8x128xf32>
    %c3 = arith.constant 3 : index
    %c0_11 = arith.constant 0 : index
    %c0_12 = arith.constant 0 : index
    %31 = vector.load %arg2[%c3, %c0_11, %c0_12] : memref<4x8x1xf32, #tpu.memory_space<vmem>>, vector<1x8x1xf32>
    %32 = vector.shape_cast %31 : vector<1x8x1xf32> to vector<8x1xf32>
    %33 = vector.shape_cast %32 : vector<8x1xf32> to vector<1x8x1xf32>
    %34 = vector.extract_strided_slice %0 {offsets = [0, 3, 0], sizes = [2, 1, 128], strides = [1, 1, 1]} : vector<2x4x128xf32> to vector<2x1x128xf32>
    %35 = vector.shape_cast %34 : vector<2x1x128xf32> to vector<2x128xf32>
    %36 = vector.shape_cast %35 : vector<2x128xf32> to vector<2x1x128xf32>
    %37 = vector.broadcast %33 : vector<1x8x1xf32> to vector<2x8x128xf32>
    %38 = vector.broadcast %36 : vector<2x1x128xf32> to vector<2x8x128xf32>
    %39 = arith.mulf %37, %38 : vector<2x8x128xf32>
    %40 = arith.addf %30, %39 : vector<2x8x128xf32>
    %41 = vector.shape_cast %1 : vector<8x1xf32> to vector<1x8x1xf32>
    %42 = vector.broadcast %41 : vector<1x8x1xf32> to vector<2x8x128xf32>
    %43 = arith.addf %40, %42 : vector<2x8x128xf32>
    %c0_13 = arith.constant 0 : index
    %c0_14 = arith.constant 0 : index
    %c0_15 = arith.constant 0 : index
    %44 = vector.load %arg4[%c0_13, %c0_14, %c0_15] : memref<2x8x128xf32, #tpu.memory_space<vmem>>, vector<2x8x128xf32>
    tpu.vector_store %arg4[%c0_13, %c0_14, %c0_15], %43 {strides = array<i32>} : memref<2x8x128xf32, #tpu.memory_space<vmem>>, vector<2x8x128xf32>,
    %cst = arith.constant dense<0xFF800000> : vector<2x128xf32>
    %45 = vector.multi_reduction <maximumf>, %43, %cst [1] : vector<2x8x128xf32> to vector<2x128xf32>
    %46 = vector.shape_cast %45 : vector<2x128xf32> to vector<2x1x128xf32>
    %cst_16 = arith.constant dense<0xFF800000> : vector<1x128xf32>
    %47 = vector.multi_reduction <maximumf>, %46, %cst_16 [0] : vector<2x1x128xf32> to vector<1x128xf32>
    %48 = vector.shape_cast %47 : vector<1x128xf32> to vector<1x1x128xf32>
    %49 = vector.broadcast %48 : vector<1x1x128xf32> to vector<2x8x128xf32>
    %50 = arith.subf %43, %49 : vector<2x8x128xf32>
    %51 = math.exp %50 : vector<2x8x128xf32>
    %cst_17 = arith.constant dense<0.000000e+00> : vector<2x128xf32>
    %52 = vector.multi_reduction <add>, %51, %cst_17 [1] : vector<2x8x128xf32> to vector<2x128xf32>
    %53 = vector.shape_cast %52 : vector<2x128xf32> to vector<2x1x128xf32>
    %cst_18 = arith.constant dense<0.000000e+00> : vector<1x128xf32>
    %54 = vector.multi_reduction <add>, %53, %cst_18 [0] : vector<2x1x128xf32> to vector<1x128xf32>
    %55 = vector.shape_cast %54 : vector<1x128xf32> to vector<1x1x128xf32>
    %56 = arith.mulf %51, %50 : vector<2x8x128xf32>
    %cst_19 = arith.constant dense<0.000000e+00> : vector<2x128xf32>
    %57 = vector.multi_reduction <add>, %56, %cst_19 [1] : vector<2x8x128xf32> to vector<2x128xf32>
    %58 = vector.shape_cast %57 : vector<2x128xf32> to vector<2x1x128xf32>
    %cst_20 = arith.constant dense<0.000000e+00> : vector<1x128xf32>
    %59 = vector.multi_reduction <add>, %58, %cst_20 [0] : vector<2x1x128xf32> to vector<1x128xf32>
    %60 = vector.shape_cast %59 : vector<1x128xf32> to vector<1x1x128xf32>
    %61 = math.log %55 : vector<1x1x128xf32>
    %62 = tpu.reciprocal %55 {approx = true} : vector<1x1x128xf32> -> vector<1x1x128xf32>
    %63 = arith.mulf %60, %62 : vector<1x1x128xf32>
    %64 = arith.subf %61, %63 : vector<1x1x128xf32>
    %65 = vector.shape_cast %64 : vector<1x1x128xf32> to vector<1x128xf32>
    %c0_21 = arith.constant 0 : index
    %c0_22 = arith.constant 0 : index
    %66 = vector.load %arg5[%c0_21, %c0_22] : memref<1x128xf32, #tpu.memory_space<vmem>>, vector<1x128xf32>
    tpu.vector_store %arg5[%c0_21, %c0_22], %65 {strides = array<i32>} : memref<1x128xf32, #tpu.memory_space<vmem>>, vector<1x128xf32>,
    return
  }
  func.func @transform_0(%arg0: i32) -> (i32, i32, i32) {
    %c0_i32 = arith.constant 0 : i32
    %c0_i32_0 = arith.constant 0 : i32
    %c0_i32_1 = arith.constant 0 : i32
    return %c0_i32, %c0_i32_0, %arg0 : i32, i32, i32
  }
  func.func @transform_1(%arg0: i32) -> (i32, i32, i32) {
    %c0_i32 = arith.constant 0 : i32
    %c0_i32_0 = arith.constant 0 : i32
    %c0_i32_1 = arith.constant 0 : i32
    %c0_i32_2 = arith.constant 0 : i32
    return %c0_i32, %c0_i32_0, %c0_i32_1 : i32, i32, i32
  }
  func.func @transform_2(%arg0: i32) -> (i32, i32) {
    %c0_i32 = arith.constant 0 : i32
    %c0_i32_0 = arith.constant 0 : i32
    %c0_i32_1 = arith.constant 0 : i32
    return %c0_i32, %c0_i32_0 : i32, i32
  }
  func.func @transform_3(%arg0: i32) -> (i32, i32, i32) {
    %c0_i32 = arith.constant 0 : i32
    %c0_i32_0 = arith.constant 0 : i32
    %c0_i32_1 = arith.constant 0 : i32
    return %c0_i32, %c0_i32_0, %arg0 : i32, i32, i32
  }
  func.func @transform_4(%arg0: i32) -> (i32, i32) {
    %c0_i32 = arith.constant 0 : i32
    %c0_i32_0 = arith.constant 0 : i32
    return %c0_i32, %arg0 : i32, i32
  }
}

</mosaic_0001>

<bundles_post_ra>
// kernel: tpu_custom_call.1
= control target key start
LH: loop header
LB: loop body
LE: loop exit
PB: predicated region body
PF: predicated region fallthrough
CT: control target
= control target key end

     0   :  { %10 = vsyncpa [#allocation4], 0  ;;  %s874_s0 = inlined_call_operand.vmem [shape: f32[2,4,256], index: 0, kind: input, shape index: {}]   ;;  %s875_s1 = inlined_call_operand.vmem [shape: f32[4,8,1], index: 1, kind: input, shape index: {}]   ;;  %s876_s2 = inlined_call_operand.vmem [shape: f32[8,1], index: 2, kind: input, shape index: {}]   ;;  %s877_s3 = inlined_call_operand.hbm [shape: f32[2,8,256], index: 3, kind: output, shape index: {0}]   ;;  %s878_s4 = inlined_call_operand.hbm [shape: f32[1,256], index: 4, kind: output, shape index: {1}]  }
   0x1   :  { %12 = vsyncpa [#allocation4 + $0x1], 0 }
   0x2   :  { %13 = vsyncpa [#allocation6], 0 }
   0x3   :  { %15 = vsyncpa [#allocation6 + $0x1], 0  ;;  %s716_s15 = smov 0   ;;  %s718_s16 = smov 0  }
   0x4   :  { %s720_s17 = smov 0   ;;  %s722_s18 = smov 0  }
   0x5 LB: > { %s737_s19 = sadd.s32 4294967295, %s683_s18   ;;  %s515_s20 = sadd.s32 4294967294, %s683_s18   ;;  %s683_s18 = sphi %s722_s18, %s884_s18   ;;  %s679_s17 = sphi %s720_s17, %s883_s17   ;;  %s675_s16 = sphi %s718_s16, %s882_s16   ;;  %s671_s15 = sphi %s716_s15, %s881_s15  }
   0x6   : > { %s741_s21 = sadd.s32 1, %s683_s18   ;;  %s28_s22 = sadd.s32 1, %s679_s17 }
   0x7   : > { %s25_s23 = ssub.s32 %s683_s18, %s741_s21  ;;  %p35_p0 = scmp.ne.s32.totalorder %s679_s17, %s675_s16 }
   0x8   : > { %p26_p1 = scmp.eq.s32.totalorder %s25_s23, 0  ;;  %p36_p2 = scmp.eq.s32.totalorder %s683_s18, 0 }
   0x9   : > { %p107_p3 = scmp.eq.s32.totalorder %s737_s19, 1  ;;  %p112_p4 = scmp.ne.s32.totalorder %s675_s16, %s671_s15 }
   0xa   : > { %s753_s24 = scalar_select %p26_p1, %s679_s17, %s28_s22  }
   0xb   : > { %p37_p5 = por %p36_p2, %p35_p0  ;;  %p755_p6 = por %p107_p3, %p35_p0 }
   0xc   : > { %p113_p7 = scmp.eq.s32.totalorder %s515_s20, 1  ;;  %p517_p9 = scmp.ge.s32.totalorder %s683_s18, 2 }
   0xe   : > { %p759_p8 = por %p113_p7, %p112_p4  ;;  %161 = sbr.rel (%p517_p9) target bundleno = 28 (0x1c), region = 24 }
  0x15   : > { %164 = sbr.rel (!%p37_p5) target bundleno = 28 (0x1c), region = 28  ;;  %s166_s27 = sand.u32 (%p37_p5), 1, %s679_s17  }
  0x16   : > { %s519_s28 = sshll.u32 (%p37_p5), %s683_s18, 2  ;;  %s518_s29 = sshll.u32 (%p37_p5), %s166_s27, 3 }
  0x17   : > { %s170_s6 = scalar_lea.vmem (%p37_p5), %s874_s0, %s519_s28  ;;  %s168_s7 = scalar_lea.vmem (%p37_p5), [#allocation2], %s518_s29 }
  0x18   : > { %v186_v0 = vld [vmem:[%s170_s6] sm:$0xf] (%p37_p5)  ;;  %v188_v1 = vld [vmem:[%s170_s6 + $0x8] sm:$0xf] (%p37_p5) }
  0x19   : > { %187 = vst [vmem:[%s168_s7] sm:$0xf] (%p37_p5), %v186_v0  ;;  %189 = vst [vmem:[%s168_s7 + $0x4] sm:$0xf] (%p37_p5), %v188_v1 }
  0x1c PF: > { %p520_p10 = scmp.ge.s32.totalorder %s683_s18, 1  ;;  %p215_p11 = scmp.lt.s32.totalorder %s683_s18, 3 }
  0x1e   : > { %p216_p12 = pnand %p520_p10, %p215_p11 }
  0x1f   : > { %v524_v2 = vld [vmem:[%s875_s1 + $0x10] sm:$0xff] (!%p216_p12)  ;;  %v254_v3 = vld [vmem:[%s875_s1] sm:$0xff] (!%p216_p12)  ;;  %v685_v4 = vmov (!%p216_p12), 0   ;;  %v525_v5 = vld [vmem:[%s875_s1 + $0x18] sm:$0xff] (!%p216_p12)  ;;  %v260_v8 = vlaneseq (!%p216_p12)  ;;  %s789_s27 = sand.u32 (!%p216_p12), 1, %s675_s16   ;;  %s527_s7 = sshll.u32 (!%p216_p12), %s737_s19, 7 }
  0x20   : > { %219 = sbr.rel (%p216_p12) target bundleno = 260 (0x104), region = 69  ;;  %580 = vset.pattern.permute.xlu1 (!%p216_p12), %v685_v4  ;;  %579 = vset.pattern.permute.xlu0 (!%p216_p12), %v685_v4  ;;  %v523_v6 = vld [vmem:[%s875_s1 + $0x8] sm:$0xff] (!%p216_p12)  ;;  %v253_v7 = vld [vmem:[%s876_s2] sm:$0xff] (!%p216_p12)  ;;  %s521_s28 = sshll.u32 (!%p216_p12), %s789_s27, 3 }
  0x21   : > { %293 = vperm.xlu1 (!%p216_p12), %580, %v524_v2   ;;  %257 = vperm.xlu0 (!%p216_p12), %579, %v254_v3   ;;  %v261_v9 = vshrl.u32 (!%p216_p12), %v260_v8, 7  ;;  %s224_s29 = scalar_lea.vmem (!%p216_p12), [#allocation2], %s521_s28  ;;  %s522_s30 = sshll.u32 (!%p216_p12), %s789_s27, 4 }
  0x22   : > { %v251_v12 = vld [vmem:[%s224_s29] sm:$0xf] (!%p216_p12)  ;;  %v252_v13 = vld [vmem:[%s224_s29 + $0x4] sm:$0xf] (!%p216_p12)  ;;  %s244_s5 = scalar_lea.vmem (!%p216_p12), [#allocation3], %s522_s30  ;;  %s799_s10 = scalar_lea.hbm (!%p216_p12), %s877_s3, %s527_s7 }
  0x23   : > { %v262_v10 = vsub.s32 (!%p216_p12), 0, %v261_v9  ;;  %v279_v11 = vsub.s32 (!%p216_p12), 1, %v261_v9  ;;  %v298_v14 = vsub.s32 (!%p216_p12), 2, %v261_v9  ;;  %v317_v17 = vsub.s32 (!%p216_p12), 3, %v261_v9  ;;  %s406_s6 = sshll.u32 (!%p216_p12), %s244_s5, 4  ;;  %s390_s11 = scalar_lea.sflag (!%p216_p12), [#allocation4], %s789_s27  ;;  %s794_s6 = int_to_ptr.vmem [resolvable:$true] %s406_s6 }
  0x24   : > { %s589_s12 = scalar_lea.vmem (!%p216_p12), %s794_s6, 256  ;;  %s686_s13 = smov (!%p216_p12), [#allocation3]  }
  0x25   : > { %312 = vperm.xlu1 (!%p216_p12), %580, %v525_v5   ;;  %274 = vperm.xlu0 (!%p216_p12), %579, %v523_v6   ;;  %v263_v18 = vrot.slane (!%p216_p12), %v251_v12, %v262_v10  ;;  %v267_v19 = vrot.slane (!%p216_p12), %v252_v13, %v262_v10  ;;  %v280_v20 = vrot.slane (!%p216_p12), %v251_v12, %v279_v11  ;;  %p590_p13 = scmp.ne.s32.totalorder (!%p216_p12), %s794_s6, %s589_s12  ;;  %s593_s14 = sshll.u32 (!%p216_p12), %s686_s13, 4  ;;  %s594_s14 = int_to_ptr.vmem [resolvable:$false] %s593_s14 }
  0x26   : > { %v284_v21 = vrot.slane (!%p216_p12), %v252_v13, %v279_v11  ;;  %v299_v22 = vrot.slane (!%p216_p12), %v251_v12, %v298_v14  ;;  %v303_v23 = vrot.slane (!%p216_p12), %v252_v13, %v298_v14  ;;  %v318_v24 = vrot.slane (!%p216_p12), %v251_v12, %v317_v17  ;;  %s595_s20 = scalar_lea.vmem (!%p216_p12), %s594_s14, 512  ;;  %p596_p2 = scmp.lt.s32.totalorder (!%p216_p12), %s794_s6, %s594_s14 }
  0x27   : > { %v322_v25 = vrot.slane %v252_v13, %v317_v17  ;;  %p591_p0 = pnand %p590_p13, %p755_p6  ;;  %p597_p3 = scmp.lt.s32.totalorder %s595_s20, %s589_s12 }
  0x29   : > { %329 = vperm.xlu0 %579, %v253_v7   ;;  %p592_p1 = pneg %p591_p0  ;;  %p598_p4 = por %p597_p3, %p596_p2 }
  0x2b   : > { %p599_p5 = pnand %p598_p4, %p592_p1 }
  0xa0   : > { %v294_v15 = vpop.permute.xlu1 %293  ;;  %v258_v16 = vpop.permute.xlu0 %257 }
  0xa1   : > { %v268_v27 = vmul.f32 %v263_v18, %v258_v16  ;;  %v269_v28 = vmul.f32 %v267_v19, %v258_v16  ;;  %v304_v32 = vmul.f32 %v299_v22, %v294_v15  ;;  %v305_v33 = vmul.f32 %v303_v23, %v294_v15 }
  0xa4   : > { %v275_v26 = vpop.permute.xlu0 %274  ;;  %v313_v31 = vpop.permute.xlu1 %312 }
  0xa5   : > { %v285_v29 = vmul.f32 %v280_v20, %v275_v26  ;;  %v286_v30 = vmul.f32 %v284_v21, %v275_v26  ;;  %v323_v36 = vmul.f32 %v318_v24, %v313_v31  ;;  %v324_v37 = vmul.f32 %v322_v25, %v313_v31 }
  0xa7   : > { %v287_v34 = vadd.f32 %v285_v29, %v268_v27  ;;  %v288_v35 = vadd.f32 %v286_v30, %v269_v28 }
  0xa8   : > { %v330_v42 = vpop.permute.xlu0 %329 }
  0xa9   : > { %v306_v38 = vadd.f32 %v304_v32, %v287_v34  ;;  %v307_v39 = vadd.f32 %v305_v33, %v288_v35 }
  0xab   : > { %v325_v40 = vadd.f32 %v323_v36, %v306_v38  ;;  %v326_v41 = vadd.f32 %v324_v37, %v307_v39 }
  0xad   : > { %v332_v43 = vadd.f32 %v330_v42, %v325_v40  ;;  %v333_v44 = vadd.f32 %v330_v42, %v326_v41 }
  0xaf   : > { %334 = vst [vmem:[%s244_s5] sm:$0xff] %v332_v43  ;;  %335 = vst [vmem:[%s244_s5 + $0x8] sm:$0xff] %v333_v44  ;;  %v336_v45 = vrot.slane %v332_v43, 4  ;;  %v342_v46 = vrot.slane %v333_v44, 4 }
  0xb0   : > { %602 = shalt.err (!%p599_p5)
}
  0xb1   : > { %s603_s22 = scalar_lea.hbm %s799_s10, 256  ;;  %s607_s29 = scalar_lea.hbm %s877_s3, 512 }
  0xb2   : > { %p604_p7 = scmp.ne.s32.totalorder %s799_s10, %s603_s22  ;;  %p608_p12 = scmp.lt.u32.totalorder %s799_s10, %s877_s3 }
  0xb3   : > { %p609_p13 = scmp.lt.u32.totalorder %s607_s29, %s603_s22  ;;  %p611_p1 = scmp.lt.u32.totalorder %s603_s22, %s799_s10 }
  0xb4   : > { %p605_p10 = pnand %p604_p7, %p755_p6 }
  0xb5   : > { %p610_p0 = por %p609_p13, %p608_p12 }
  0xb6   : > { %p606_p11 = pneg %p605_p10 }
  0xb7   : > { %p612_p2 = por %p611_p1, %p610_p0 }
  0xb9   : > { %p613_p3 = pnand %p612_p2, %p606_p11 }
  0xbb   : > { %616 = shalt.err (!%p613_p3)
}
  0xbc   : > { %s687_s7 = smov 128   ;;  %s688_s8 = smov 256   ;;  %v337_v47 = vmax.f32 %v332_v43, %v336_v45  ;;  %v343_v48 = vmax.f32 %v333_v44, %v342_v46 }
  0xbd   : > { %s689_s9 = smov 8   ;;  %s395_s20 = scalar_lea.sflag [#allocation6], %s789_s27 }
  0xbe   : > { %531 = dma.vmem_to_hbm [thread:$0]  (%p755_p6), %s794_s6, 256, %s799_s10, %s390_s11, %s687_s7, %s688_s8, %s689_s9   ;;  %v338_v49 = vrot.slane %v337_v47, 2  ;;  %v344_v50 = vrot.slane %v343_v48, 2 }
  0xbf   : > { %s528_s6 = sshll.u32 %s737_s19, 4  ;;  %s250_s10 = scalar_lea.vmem [#allocation5], %s789_s27 }
  0xc0   : > { %v339_v51 = vmax.f32 %v337_v47, %v338_v49  ;;  %v345_v52 = vmax.f32 %v343_v48, %v344_v50  ;;  %s422_s11 = sshll.u32 %s250_s10, 4  ;;  %s830_s14 = scalar_lea.hbm %s878_s4, %s528_s6  ;;  %s832_s11 = int_to_ptr.vmem [resolvable:$true] %s422_s11 }
  0xc1   : > { %s617_s22 = scalar_lea.vmem %s832_s11, 16  ;;  %s690_s19 = smov [#allocation5]  }
  0xc2   : > { %v340_v53 = vrot.slane %v339_v51, 1  ;;  %v346_v54 = vrot.slane %v345_v52, 1  ;;  %p618_p4 = scmp.ne.s32.totalorder %s832_s11, %s617_s22  ;;  %s621_s23 = sshll.u32 %s690_s19, 4  ;;  %s622_s23 = int_to_ptr.vmem [resolvable:$false] %s621_s23 }
  0xc3   : > { %s623_s28 = scalar_lea.vmem %s622_s23, 32  ;;  %p624_p10 = scmp.lt.s32.totalorder %s832_s11, %s622_s23 }
  0xc4   : > { %v341_v55 = vmax.f32 %v339_v51, %v340_v53  ;;  %v347_v56 = vmax.f32 %v345_v52, %v346_v54  ;;  %p619_p5 = pnand %p618_p4, %p755_p6  ;;  %p625_p11 = scmp.lt.s32.totalorder %s623_s28, %s617_s22 }
  0xc6   : > { %v348_v57 = vmax.f32 %v341_v55, %v347_v56  ;;  %p620_p7 = pneg %p619_p5  ;;  %p626_p12 = por %p625_p11, %p624_p10 }
  0xc8   : > { %v349_v58 = vsub.f32 %v332_v43, %v348_v57  ;;  %v350_v59 = vsub.f32 %v333_v44, %v348_v57  ;;  %p627_p13 = pnand %p626_p12, %p620_p7 }
  0xca   : > { %v351_v60 = vmul.f32 1.442695, %v349_v58  ;;  %v353_v61 = vmul.f32 1.442695, %v350_v59 }
  0xcc   : > { %581 = vpow2.f32 %v351_v60 }
  0xcd   : > { %583 = vpow2.f32 %v353_v61 }
  0xd6   : > { %v582_v62 = vpop.eup %581 }
  0xd7   : > { %v584_v63 = vpop.eup %583  ;;  %v368_v0 = vmul.f32 %v582_v62, %v349_v58  ;;  %v355_v1 = vrot.slane %v582_v62, 4 }
  0xd8   : > { %v369_v2 = vmul.f32 %v584_v63, %v350_v59  ;;  %v361_v3 = vrot.slane %v584_v63, 4 }
  0xd9   : > { %v370_v4 = vrot.slane %v368_v0, 4  ;;  %v356_v5 = vadd.f32 %v582_v62, %v355_v1 }
  0xda   : > { %v376_v6 = vrot.slane %v369_v2, 4  ;;  %v362_v7 = vadd.f32 %v584_v63, %v361_v3 }
  0xdb   : > { %v357_v8 = vrot.slane %v356_v5, 2  ;;  %v371_v9 = vadd.f32 %v370_v4, %v368_v0 }
  0xdc   : > { %v377_v10 = vadd.f32 %v376_v6, %v369_v2  ;;  %v363_v11 = vrot.slane %v362_v7, 2 }
  0xdd   : > { %v358_v12 = vadd.f32 %v357_v8, %v356_v5  ;;  %v372_v15 = vrot.slane %v371_v9, 2 }
  0xde   : > { %v364_v13 = vadd.f32 %v363_v11, %v362_v7  ;;  %v378_v16 = vrot.slane %v377_v10, 2 }
  0xdf   : > { %v359_v14 = vrot.slane %v358_v12, 1  ;;  %v373_v21 = vadd.f32 %v372_v15, %v371_v9 }
  0xe0   : > { %v365_v17 = vrot.slane %v364_v13, 1  ;;  %v379_v22 = vadd.f32 %v378_v16, %v377_v10 }
  0xe1   : > { %v360_v18 = vadd.f32 %v359_v14, %v358_v12  ;;  %v374_v23 = vrot.slane %v373_v21, 1 }
  0xe2   : > { %v366_v19 = vadd.f32 %v365_v17, %v364_v13  ;;  %v380_v24 = vrot.slane %v379_v22, 1 }
  0xe3   : > { %v375_v25 = vadd.f32 %v374_v23, %v373_v21 }
  0xe4   : > { %v367_v20 = vadd.f32 %v366_v19, %v360_v18  ;;  %v381_v26 = vadd.f32 %v380_v24, %v379_v22 }
  0xe6   : > { %585 = vlog2.f32 %v367_v20  ;;  %v382_v28 = vadd.f32 %v381_v26, %v375_v25 }
  0xe7   : > { %587 = vrcp.f32 %v367_v20 }
  0xf0   : > { %v586_v27 = vpop.eup %585 }
  0xf1   : > { %v588_v29 = vpop.eup %587  ;;  %v384_v30 = vmul.f32 0.6931472, %v586_v27 }
  0xf2   : > { %v386_v31 = vmul.f32 %v588_v29, %v382_v28 }
  0xf4   : > { %v387_v32 = vsub.f32 %v384_v30, %v386_v31 }
  0xf6   : > { %388 = vst [vmem:[%s250_s10] sm:$0x1] %v387_v32 }
  0xf7   : > { %630 = shalt.err (!%p627_p13)
}
  0xf8   : > { %s631_s27 = scalar_lea.hbm %s830_s14, 16  ;;  %s635_s5 = scalar_lea.hbm %s878_s4, 32 }
  0xf9   : > { %p632_p0 = scmp.ne.s32.totalorder %s830_s14, %s631_s27  ;;  %p636_p3 = scmp.lt.u32.totalorder %s830_s14, %s878_s4 }
  0xfa   : > { %p637_p4 = scmp.lt.u32.totalorder %s635_s5, %s631_s27  ;;  %p639_p7 = scmp.lt.u32.totalorder %s631_s27, %s830_s14 }
  0xfb   : > { %p633_p1 = pnand %p632_p0, %p755_p6 }
  0xfc   : > { %p638_p5 = por %p637_p4, %p636_p3 }
  0xfd   : > { %p634_p2 = pneg %p633_p1 }
  0xfe   : > { %p640_p10 = por %p639_p7, %p638_p5 }
 0x100   : > { %p641_p11 = pnand %p640_p10, %p634_p2 }
 0x102   : > { %644 = shalt.err (!%p641_p11)
}
 0x103   : > { %532 = dma.vmem_to_hbm [thread:$0]  (%p755_p6), %s832_s11, 16, %s830_s14, %s395_s20  }
 0x104 PF: > { %s434_s9 = sand.u32 1, %s671_s15   ;;  %p536_p12 = pnand %p517_p9, %p759_p8 }
 0x105   : > { %s435_s6 = scalar_lea.sflag [#allocation4], %s434_s9 }
 0x106   : > { %662 = dma.done.wait (!%p536_p12), %s435_s6, 256  }
 0x107   : > { %664 = vsyncadd (!%p536_p12), %s435_s6, 4294967040  ;;  %s444_s10 = scalar_lea.sflag [#allocation6], %s434_s9 }
 0x108   : > { %666 = dma.done.wait (!%p536_p12), %s444_s10, 16  }
 0x109   : > { %668 = vsyncadd (!%p536_p12), %s444_s10, 4294967280  ;;  %p18_p6 = scmp.ge.s32.totalorder %s741_s21, 4   ;;  %s881_s15 = smov %s675_s16 }
 0x10a   : > { %s882_s16 = smov %s679_s17  ;;  %s883_s17 = smov %s753_s24 }
 0x10b   : > { %s884_s18 = smov %s741_s21  ;;  %20 = sbr.rel (!%p18_p6) target bundleno = 5 (0x5), region = 133 }
 0x112   :  { %448 = vsyncpa [#allocation4], 1 }
 0x113   :  { %450 = vsyncpa [#allocation4 + $0x1], 1 }
 0x114   :  { %451 = vsyncpa [#allocation6], 1 }
 0x115   :  { %453 = vsyncpa [#allocation6 + $0x1], 1 }

</bundles_post_ra>
